<compile_context>
chip_gen: v6e
topology: v6e:2x2x1
jax: 0.10.0
libtpu: 0.0.40
codegen_flags: <defaults>
</compile_context>

<pallas_src>
import functools

import jax
import jax.numpy as jnp
from jax.experimental import pallas as pl
from jax.experimental.pallas import tpu as pltpu

_LANE = 128
_MIB = 1024 * 1024


def _attention_kernel(x_ref, h_ref, wT_ref, b_ref, o_ref, e_ref, acc_ref=None,
                      *, compute_dtype, approx_recip):
    # x_ref  : (TB, S,  Hp)  lstm_output block, resident across the key axis
    # h_ref  : (TB, Tt, Hp)  lstm_hidden key block
    # wT_ref : (Hp, Hp)      pre-transposed Linear weight (W^T), compute dtype
    # b_ref  : (1, Hp)       Linear bias, f32
    # o_ref  : (TB, S,  Hp)  output block (doubles as accumulator when f32)
    # e_ref  : (TB, S,  Hp)  scratch: Linear output E
    # acc_ref: (TB, S,  Hp)  optional f32 accumulator (None when o_ref is f32)
    t = pl.program_id(1)
    nt = pl.num_programs(1)
    TB, S, Hp = x_ref.shape
    Tt = h_ref.shape[1]
    acc = o_ref if acc_ref is None else acc_ref

    @pl.when(t == 0)
    def _():
        # Linear: E = lstm_output @ W^T + b, one tall 2-D MXU matmul per block.
        x2 = x_ref[...].reshape(TB * S, Hp).astype(compute_dtype)
        e2 = jnp.dot(x2, wT_ref[...], preferred_element_type=jnp.float32)
        e2 = e2 + b_ref[...]
        e_ref[...] = e2.reshape(TB, S, Hp).astype(e_ref.dtype)

    # Key block sliced from the resident full block — lstm_output is never
    # DMA'd twice.
    start = pl.multiple_of(t * Tt, Tt)
    xt = x_ref[:, pl.ds(start, Tt), :]

    # Scores for this key block: (TB, S, Tt); contraction on the last dim of
    # both operands, so no materialized transpose of h.
    s = jnp.einsum("bsh,bth->bst", e_ref[...],
                   h_ref[...].astype(compute_dtype),
                   preferred_element_type=jnp.float32)

    # softmax(dim=1) of the (B, S, S) tensor == the query axis (axis 1 here).
    # Each key column is independent, so the blockwise softmax is exact — no
    # online-softmax bookkeeping needed.
    s = s - jnp.max(s, axis=1, keepdims=True)
    p = jnp.exp(s)
    p = p * pl.reciprocal(jnp.sum(p, axis=1, keepdims=True), approx=approx_recip)

    # A[:, :, key_block] @ lstm_output[key_block]  (f32 accumulation on MXU).
    contrib = jnp.einsum("bst,bth->bsh",
                         p.astype(compute_dtype), xt.astype(compute_dtype),
                         preferred_element_type=jnp.float32)

    # First key block writes; later blocks accumulate (no zero-fill pass).
    @pl.when(t == 0)
    def _():
        acc[...] = contrib.astype(acc.dtype)

    @pl.when(t > 0)
    def _():
        acc[...] += contrib.astype(acc.dtype)

    if acc_ref is not None:
        @pl.when(t == nt - 1)
        def _():
            o_ref[...] = acc_ref[...].astype(o_ref.dtype)


def _tpu_vmem_and_cores():
    """Best-effort (VMEM bytes, TensorCores/chip) query with safe fallbacks."""
    vmem_cap = 128 * _MIB
    try:
        info = pltpu.get_tpu_info()
        vmem_cap = int(getattr(info, "vmem_capacity_bytes", vmem_cap))
    except Exception:
        pass
    # Heuristic: 64 MiB-per-TC parts (v7x-class) have 2 TensorCores per chip;
    # 128 MiB parts (v5e/v6e) have a single TensorCore.
    n_tc = 2 if vmem_cap <= 64 * _MIB else 1
    return vmem_cap, n_tc


def _largest_divisor_leq(n, cap, multiple_of=1):
    for d in range(min(cap, n), 0, -1):
        if n % d == 0 and d % multiple_of == 0:
            return d
    return None


def _pick_tiles(B, S, Hp, dtype, compute_dtype, acc_in_out, budget,
                keep_two_batch_blocks):
    """Pick (TB, Tt): batch-block and key-axis block sizes."""
    in_b = jnp.dtype(dtype).itemsize
    cd_b = jnp.dtype(compute_dtype).itemsize
    sub = 8 if in_b >= 4 else (16 if in_b == 2 else 32)

    # Key-axis tile: lane dim of the score slab and MXU N/K dim -> multiple of
    # 128 (prefer up to 512); dtype-aware sublane fallback; else full S.
    if S <= 512:
        Tt = S
    else:
        Tt = (_largest_divisor_leq(S, 512, multiple_of=_LANE)
              or _largest_divisor_leq(S, 512, multiple_of=sub)
              or S)

    def est(tb):
        x_blk = tb * S * Hp * in_b
        h_blk = tb * Tt * Hp * in_b
        o_blk = tb * S * Hp * in_b
        w_blk = Hp * Hp * cd_b
        resident = 2 * (x_blk + h_blk + o_blk + w_blk)       # double-buffered I/O
        scratch = tb * S * Hp * cd_b                         # E
        if not acc_in_out:
            scratch += tb * S * Hp * 4                       # f32 accumulator
        transient = (tb * S * Hp * 4 + tb * S * Hp * cd_b    # f32 Linear out + x cast
                     + 2 * tb * S * Tt * 4                   # s, p (f32)
                     + tb * S * Tt * cd_b                    # p cast copy
                     + tb * S * Hp * 4)                      # f32 AV result
        return resident + scratch + transient

    TB = 1
    for tb in range(1, B + 1):
        if B % tb:
            continue
        if keep_two_batch_blocks and B >= 2 and B // tb < 2:
            continue  # keep both TensorCores fed on 2-TC chips
        if est(tb) <= budget:
            TB = tb
    return TB, Tt


def attention_forward(lstm_output, lstm_hidden, weight, bias, *,
                      use_bf16_matmul=False):
    """lstm_output, lstm_hidden: (B, S, H); weight: (H, H) nn.Linear layout
    (out, in); bias: (H,).  Returns (B, S, H)."""
    B, S, H = lstm_output.shape
    dtype = lstm_output.dtype

    # Lane-dense padding of the hidden dim to a multiple of 128.  Zero padding
    # is inert: padded columns of E and h contribute 0 to the scores, and the
    # padded output columns (all zero) are sliced off below.
    Hp = max(_LANE, ((H + _LANE - 1) // _LANE) * _LANE)
    if Hp != H:
        pad3 = ((0, 0), (0, 0), (0, Hp - H))
        x = jnp.pad(lstm_output, pad3)
        h = jnp.pad(lstm_hidden, pad3)
        wT = jnp.pad(weight.T, ((0, Hp - H), (0, Hp - H)))
        b2 = jnp.pad(bias, ((0, Hp - H),))
    else:
        x, h = lstm_output, lstm_hidden
        wT = weight.T
        b2 = bias

    # MXU operand dtype: input dtype, or bf16 when explicitly requested for f32
    # inputs (f32 accumulation is kept either way).
    compute_dtype = (jnp.bfloat16 if (use_bf16_matmul and dtype == jnp.float32)
                     else dtype)
    approx_recip = (dtype != jnp.float32)   # EUP approx is below bf16 resolution
    acc_in_out = (dtype == jnp.float32)     # accumulate directly into o_ref

    wT = wT.astype(compute_dtype)
    b2 = b2.reshape(1, Hp).astype(jnp.float32)

    # Generation-aware VMEM sizing.
    vmem_cap, n_tc = _tpu_vmem_and_cores()
    budget = int(vmem_cap * 0.42)
    vmem_limit = min(int(vmem_cap * 0.85), vmem_cap - 8 * _MIB)

    TB, Tt = _pick_tiles(B, S, Hp, dtype, compute_dtype, acc_in_out, budget,
                         keep_two_batch_blocks=(n_tc >= 2))
    grid = (B // TB, S // Tt)

    scratch_shapes = [pltpu.VMEM((TB, S, Hp), compute_dtype)]   # E
    if not acc_in_out:
        scratch_shapes.append(pltpu.VMEM((TB, S, Hp), jnp.float32))

    kernel = functools.partial(_attention_kernel,
                               compute_dtype=compute_dtype,
                               approx_recip=approx_recip)

    grid_spec = pltpu.PrefetchScalarGridSpec(
        num_scalar_prefetch=0,
        grid=grid,
        in_specs=[
            # Full lstm_output block: constant in t, fetched once per batch
            # block; key blocks are sliced from it inside the kernel.
            pl.BlockSpec((TB, S, Hp), lambda b, t: (b, 0, 0)),
            # Key-sliced lstm_hidden block.  (If profiling on v5e shows exposed
            # DMA at small Tt, add pipeline_mode=pl.Buffered(3) here.)
            pl.BlockSpec((TB, Tt, Hp), lambda b, t: (b, t, 0)),
            # Shared W^T and bias (constant index -> never re-fetched).
            pl.BlockSpec((Hp, Hp), lambda b, t: (0, 0)),
            pl.BlockSpec((1, Hp), lambda b, t: (0, 0)),
        ],
        out_specs=pl.BlockSpec((TB, S, Hp), lambda b, t: (b, 0, 0)),
        scratch_shapes=scratch_shapes,
    )

    out = pl.pallas_call(
        kernel,
        out_shape=jax.ShapeDtypeStruct((B, S, Hp), dtype),
        grid_spec=grid_spec,
        compiler_params=pltpu.CompilerParams(
            dimension_semantics=("parallel", "arbitrary"),
            vmem_limit_bytes=vmem_limit,
        ),
    )(x, h, wT, b2)

    return out[..., :H] if Hp != H else out


def attention_reference(lstm_output, lstm_hidden, weight, bias):
    """Pure-JAX reference matching the PyTorch forward exactly."""
    hi = jax.lax.Precision.HIGHEST
    e = jnp.einsum("bsh,oh->bso", lstm_output, weight, precision=hi) + bias
    a = jnp.einsum("bso,bto->bst", e, lstm_hidden, precision=hi)
    a = jax.nn.softmax(a, axis=1)                               # dim=1 (query)
    return jnp.einsum("bst,bth->bsh", a, lstm_output, precision=hi)


if __name__ == "__main__":
    def _check(B, S, H, key, atol=2e-3, rtol=2e-3):
        k1, k2, k3, k4 = jax.random.split(key, 4)
        lstm_output = jax.random.normal(k1, (B, S, H), dtype=jnp.float32)
        lstm_hidden = jax.random.normal(k2, (B, S, H), dtype=jnp.float32)
        # Deterministic nn.Linear(H, H) params (weight: (out, in), bias: (out,))
        weight = jax.random.normal(k3, (H, H), dtype=jnp.float32) / jnp.sqrt(H)
        bias = jax.random.normal(k4, (H,), dtype=jnp.float32) * 0.1

        out = attention_forward(lstm_output, lstm_hidden, weight, bias)
        out = jax.block_until_ready(out)
        ref = attention_reference(lstm_output, lstm_hidden, weight, bias)

        assert out.shape == (B, S, H)
        err = jnp.max(jnp.abs(out - ref))
        assert jnp.allclose(out, ref, atol=atol, rtol=rtol), f"max err {err}"

    # Small shapes consistent with the module (single grid step).
    _check(2, 8, 32, jax.random.PRNGKey(0))
    # Larger shapes that force a multi-block key axis (>=2 key blocks),
    # exercising the blockwise-softmax accumulation path.
    _check(2, 1024, 64, jax.random.PRNGKey(0))

    print("KERNEL_OK")
</pallas_src>

<mosaic_0001>
module attributes {stable_mosaic.version = 11 : i64} {
  func.func @_attention_kernel(%arg0: i32, %arg1: i32, %arg2: memref<2x8x128xf32, #tpu.memory_space<vmem>>, %arg3: memref<2x8x128xf32, #tpu.memory_space<vmem>>, %arg4: memref<128x128xf32, #tpu.memory_space<vmem>>, %arg5: memref<1x128xf32, #tpu.memory_space<vmem>>, %arg6: memref<2x8x128xf32, #tpu.memory_space<vmem>>, %arg7: memref<2x8x128xf32, #tpu.memory_space<vmem>>) attributes {dimension_semantics = [#tpu.dimension_semantics<parallel>, #tpu.dimension_semantics<arbitrary>], iteration_bounds = array<i64: 1, 1>, scalar_prefetch = 0 : i64, scratch_operands = 1 : i64, tpu.core_type = #tpu.core_type<tc>, window_params = [{transform_indices = @transform_0, window_bounds = array<i64: 2, 8, 128>}, {transform_indices = @transform_1, window_bounds = array<i64: 2, 8, 128>}, {pipeline_mode = #tpu.pipeline_mode<synchronous>, transform_indices = @transform_2, window_bounds = array<i64: 128, 128>}, {pipeline_mode = #tpu.pipeline_mode<synchronous>, transform_indices = @transform_3, window_bounds = array<i64: 1, 128>}, {transform_indices = @transform_4, window_bounds = array<i64: 2, 8, 128>}]} {
    %c0_i32 = arith.constant 0 : i32
    %0 = arith.cmpi eq, %arg1, %c0_i32 : i32
    %1 = arith.extui %0 : i1 to i32
    %c0_i32_0 = arith.constant 0 : i32
    %2 = arith.cmpi ne, %1, %c0_i32_0 : i32
    scf.if %2 {
      %c0_15 = arith.constant 0 : index
      %c0_16 = arith.constant 0 : index
      %c0_17 = arith.constant 0 : index
      %27 = vector.load %arg2[%c0_15, %c0_16, %c0_17] : memref<2x8x128xf32, #tpu.memory_space<vmem>>, vector<2x8x128xf32>
      %28 = vector.shape_cast %27 : vector<2x8x128xf32> to vector<16x128xf32>
      %c0_18 = arith.constant 0 : index
      %c0_19 = arith.constant 0 : index
      %29 = vector.load %arg4[%c0_18, %c0_19] : memref<128x128xf32, #tpu.memory_space<vmem>>, vector<128x128xf32>
      %cst_20 = arith.constant dense<0.000000e+00> : vector<16x128xf32>
      %30 = tpu.matmul %28, %29, %cst_20 {dimension_numbers = #tpu.dot_dimension_numbers<[1], [0], [0], [1], [0, 0, 1, 1], [], []>} : vector<16x128xf32>, vector<128x128xf32>, vector<16x128xf32> -> vector<16x128xf32>
      %c0_21 = arith.constant 0 : index
      %c0_22 = arith.constant 0 : index
      %31 = vector.load %arg5[%c0_21, %c0_22] : memref<1x128xf32, #tpu.memory_space<vmem>>, vector<1x128xf32>
      %32 = vector.broadcast %31 : vector<1x128xf32> to vector<16x128xf32>
      %33 = arith.addf %30, %32 : vector<16x128xf32>
      %34 = vector.shape_cast %33 : vector<16x128xf32> to vector<2x8x128xf32>
      %c0_23 = arith.constant 0 : index
      %c0_24 = arith.constant 0 : index
      %c0_25 = arith.constant 0 : index
      %35 = vector.load %arg7[%c0_23, %c0_24, %c0_25] : memref<2x8x128xf32, #tpu.memory_space<vmem>>, vector<2x8x128xf32>
      tpu.vector_store %arg7[%c0_23, %c0_24, %c0_25], %34 {strides = array<i32>} : memref<2x8x128xf32, #tpu.memory_space<vmem>>, vector<2x8x128xf32>,
    } else {
    }
    %c8_i32 = arith.constant 8 : i32
    %3 = arith.muli %arg1, %c8_i32 : i32
    %4 = tpu.assume_multiple %3, 8 : i32
    %c0 = arith.constant 0 : index
    %5 = arith.index_cast %4 : i32 to index
    %c0_1 = arith.constant 0 : index
    %6 = vector.load %arg2[%c0, %5, %c0_1] : memref<2x8x128xf32, #tpu.memory_space<vmem>>, vector<2x8x128xf32>
    %c0_2 = arith.constant 0 : index
    %c0_3 = arith.constant 0 : index
    %c0_4 = arith.constant 0 : index
    %7 = vector.load %arg7[%c0_2, %c0_3, %c0_4] : memref<2x8x128xf32, #tpu.memory_space<vmem>>, vector<2x8x128xf32>
    %c0_5 = arith.constant 0 : index
    %c0_6 = arith.constant 0 : index
    %c0_7 = arith.constant 0 : index
    %8 = vector.load %arg3[%c0_5, %c0_6, %c0_7] : memref<2x8x128xf32, #tpu.memory_space<vmem>>, vector<2x8x128xf32>
    "tpu.trace_start"() <{level = 10 : i32, message = "bsh,bth->bst"}> : () -> ()
    %cst = arith.constant dense<0.000000e+00> : vector<2x8x8xf32>
    %9 = tpu.matmul %7, %8, %cst {dimension_numbers = #tpu.dot_dimension_numbers<[2], [2], [1], [1], [0, 0, 0, 1, 1, 1], [0], [0]>} : vector<2x8x128xf32>, vector<2x8x128xf32>, vector<2x8x8xf32> -> vector<2x8x8xf32>
    "tpu.trace_stop"() : () -> ()
    %cst_8 = arith.constant dense<0xFF800000> : vector<2x8xf32>
    %10 = vector.multi_reduction <maximumf>, %9, %cst_8 [1] : vector<2x8x8xf32> to vector<2x8xf32>
    %11 = vector.shape_cast %10 : vector<2x8xf32> to vector<2x1x8xf32>
    %12 = vector.broadcast %11 : vector<2x1x8xf32> to vector<2x8x8xf32>
    %13 = arith.subf %9, %12 : vector<2x8x8xf32>
    %14 = math.exp %13 : vector<2x8x8xf32>
    %cst_9 = arith.constant dense<0.000000e+00> : vector<2x8xf32>
    %15 = vector.multi_reduction <add>, %14, %cst_9 [1] : vector<2x8x8xf32> to vector<2x8xf32>
    %16 = vector.shape_cast %15 : vector<2x8xf32> to vector<2x1x8xf32>
    %17 = tpu.reciprocal %16 : vector<2x1x8xf32> -> vector<2x1x8xf32>
    %18 = vector.broadcast %17 : vector<2x1x8xf32> to vector<2x8x8xf32>
    %19 = arith.mulf %14, %18 : vector<2x8x8xf32>
    "tpu.trace_start"() <{level = 10 : i32, message = "bst,bth->bsh"}> : () -> ()
    %cst_10 = arith.constant dense<0.000000e+00> : vector<2x8x128xf32>
    %20 = tpu.matmul %19, %6, %cst_10 {dimension_numbers = #tpu.dot_dimension_numbers<[2], [1], [1], [2], [0, 0, 0, 1, 1, 2], [0], [0]>} : vector<2x8x8xf32>, vector<2x8x128xf32>, vector<2x8x128xf32> -> vector<2x8x128xf32>
    %c0_i32_11 = arith.constant 0 : i32
    "tpu.trace_stop"() : () -> ()
    %21 = arith.cmpi eq, %arg1, %c0_i32_11 : i32
    %22 = arith.extui %21 : i1 to i32
    %c0_i32_12 = arith.constant 0 : i32
    %23 = arith.cmpi ne, %22, %c0_i32_12 : i32
    scf.if %23 {
      %c0_15 = arith.constant 0 : index
      %c0_16 = arith.constant 0 : index
      %c0_17 = arith.constant 0 : index
      %27 = vector.load %arg6[%c0_15, %c0_16, %c0_17] : memref<2x8x128xf32, #tpu.memory_space<vmem>>, vector<2x8x128xf32>
      tpu.vector_store %arg6[%c0_15, %c0_16, %c0_17], %20 {strides = array<i32>} : memref<2x8x128xf32, #tpu.memory_space<vmem>>, vector<2x8x128xf32>,
    } else {
    }
    %c0_i32_13 = arith.constant 0 : i32
    %24 = arith.cmpi sgt, %arg1, %c0_i32_13 : i32
    %25 = arith.extui %24 : i1 to i32
    %c0_i32_14 = arith.constant 0 : i32
    %26 = arith.cmpi ne, %25, %c0_i32_14 : i32
    scf.if %26 {
      %c0_15 = arith.constant 0 : index
      %c0_16 = arith.constant 0 : index
      %c0_17 = arith.constant 0 : index
      %27 = vector.load %arg6[%c0_15, %c0_16, %c0_17] : memref<2x8x128xf32, #tpu.memory_space<vmem>>, vector<2x8x128xf32>
      %28 = arith.addf %27, %20 : vector<2x8x128xf32>
      %c0_18 = arith.constant 0 : index
      %c0_19 = arith.constant 0 : index
      %c0_20 = arith.constant 0 : index
      %29 = vector.load %arg6[%c0_18, %c0_19, %c0_20] : memref<2x8x128xf32, #tpu.memory_space<vmem>>, vector<2x8x128xf32>
      tpu.vector_store %arg6[%c0_18, %c0_19, %c0_20], %28 {strides = array<i32>} : memref<2x8x128xf32, #tpu.memory_space<vmem>>, vector<2x8x128xf32>,
    } else {
    }
    return
  }
  func.func @transform_0(%arg0: i32, %arg1: i32) -> (i32, i32, i32) {
    %c0_i32 = arith.constant 0 : i32
    %c0_i32_0 = arith.constant 0 : i32
    %c0_i32_1 = arith.constant 0 : i32
    return %arg0, %c0_i32, %c0_i32_0 : i32, i32, i32
  }
  func.func @transform_1(%arg0: i32, %arg1: i32) -> (i32, i32, i32) {
    %c0_i32 = arith.constant 0 : i32
    %c0_i32_0 = arith.constant 0 : i32
    return %arg0, %arg1, %c0_i32 : i32, i32, i32
  }
  func.func @transform_2(%arg0: i32, %arg1: i32) -> (i32, i32) {
    %c0_i32 = arith.constant 0 : i32
    %c0_i32_0 = arith.constant 0 : i32
    %c0_i32_1 = arith.constant 0 : i32
    return %c0_i32, %c0_i32_0 : i32, i32
  }
  func.func @transform_3(%arg0: i32, %arg1: i32) -> (i32, i32) {
    %c0_i32 = arith.constant 0 : i32
    %c0_i32_0 = arith.constant 0 : i32
    %c0_i32_1 = arith.constant 0 : i32
    return %c0_i32, %c0_i32_0 : i32, i32
  }
  func.func @transform_4(%arg0: i32, %arg1: i32) -> (i32, i32, i32) {
    %c0_i32 = arith.constant 0 : i32
    %c0_i32_0 = arith.constant 0 : i32
    %c0_i32_1 = arith.constant 0 : i32
    return %arg0, %c0_i32, %c0_i32_0 : i32, i32, i32
  }
}

</mosaic_0001>

<bundles_post_ra>
// kernel: tpu_custom_call.1
= control target key start
LH: loop header
LB: loop body
LE: loop exit
PB: predicated region body
PF: predicated region fallthrough
CT: control target
= control target key end

     0   :  { %9 = vsyncpa [#allocation4], 0  ;;  %s799_s0 = inlined_call_operand.hbm [shape: f32[2,8,128], index: 0, kind: input, shape index: {}]   ;;  %s800_s1 = inlined_call_operand.hbm [shape: f32[2,8,128], index: 1, kind: input, shape index: {}]   ;;  %s801_s2 = inlined_call_operand.hbm [shape: f32[128,128], index: 2, kind: input, shape index: {}]   ;;  %s802_s3 = inlined_call_operand.vmem [shape: f32[1,128], index: 3, kind: input, shape index: {}]   ;;  %s803_s4 = inlined_call_operand.hbm [shape: f32[2,8,128], index: 4, kind: output, shape index: {}]  }
   0x1   :  { %10 = vsyncpa [#allocation7], 0 }
   0x2   :  { %11 = vsyncpa [#allocation5], 0  ;;  %s717_s15 = smov [#allocation6]   ;;  %s718_s17 = smov [#allocation3]  }
   0x3   :  { %s29_s16 = sshll.u32 %s717_s15, 4  ;;  %s17_s18 = sshll.u32 %s718_s17, 4  ;;  %s30_s16 = int_to_ptr.vmem [resolvable:$true] %s29_s16  ;;  %s18_s18 = int_to_ptr.vmem [resolvable:$true] %s17_s18 }
   0x4   :  { %s639_s19 = scalar_lea.vmem %s30_s16, 256  ;;  %p644_p1 = scmp.lt.s32.totalorder %s30_s16, %s30_s16 }
   0x5   :  { %p640_p0 = scmp.ne.s32.totalorder %s30_s16, %s639_s19  ;;  %p645_p2 = scmp.lt.s32.totalorder %s639_s19, %s639_s19 }
   0x7   :  { %p646_p3 = por %p645_p2, %p644_p1 }
   0x9   :  { %p647_p4 = pnand %p646_p3, %p640_p0 }
   0xb   :  { %650 = shalt.err (!%p647_p4)
}
   0xc   :  { %s719_s20 = smov 128   ;;  %s720_s21 = smov 8  }
   0xd   :  { %35 = dma.hbm_to_vmem [thread:$0]  %s800_s1, 256, %s30_s16, [#allocation7], %s719_s20, %s719_s20, %s720_s21  }
   0xe   :  { %s659_s24 = scalar_lea.vmem %s18_s18, 256  ;;  %p664_p6 = scmp.lt.s32.totalorder %s18_s18, %s18_s18 }
   0xf   :  { %p660_p5 = scmp.ne.s32.totalorder %s18_s18, %s659_s24  ;;  %p665_p7 = scmp.lt.s32.totalorder %s659_s24, %s659_s24 }
  0x11   :  { %p666_p8 = por %p665_p7, %p664_p6 }
  0x13   :  { %p667_p9 = pnand %p666_p8, %p660_p5 }
  0x15   :  { %670 = shalt.err (!%p667_p9)
}
  0x16   :  { %23 = dma.hbm_to_vmem [thread:$0]  %s799_s0, 256, %s18_s18, [#allocation4], %s719_s20, %s719_s20, %s720_s21  }
  0x17   :  { %s721_s27 = smov [#allocation8]  }
  0x18   :  { %s41_s28 = sshll.u32 %s721_s27, 4  ;;  %s42_s28 = int_to_ptr.vmem [resolvable:$true] %s41_s28 }
  0x19   :  { %s679_s29 = scalar_lea.vmem %s42_s28, 2048  ;;  %p684_p11 = scmp.lt.s32.totalorder %s42_s28, %s42_s28 }
  0x1a   :  { %p680_p10 = scmp.ne.s32.totalorder %s42_s28, %s679_s29  ;;  %p685_p12 = scmp.lt.s32.totalorder %s679_s29, %s679_s29 }
  0x1c   :  { %p686_p13 = por %p685_p12, %p684_p11 }
  0x1e   :  { %p687_p0 = pnand %p686_p13, %p680_p10 }
  0x20   :  { %690 = shalt.err (!%p687_p0)
}
  0x21   :  { %47 = dma.hbm_to_vmem [thread:$0]  %s801_s2, 2048, %s42_s28, [#allocation7], %s719_s20, %s719_s20, %s720_s21  }
  0x22   :  { %711 = dma.done.wait [#allocation4], 256  }
  0x23   :  { %712 = vsyncadd [#allocation4], 4294967040 }
  0x24   :  { %713 = dma.done.wait [#allocation7], 2304  }
  0x25   :  { %714 = vsyncadd [#allocation7], 4294964992  ;;  %v80_v0 = vld [vmem:[#allocation8 + $0x78] sm:$0xff]  ;;  %v79_v1 = vld [vmem:[#allocation8 + $0x70] sm:$0xff]  ;;  %v722_v18 = vmov 0.0   ;;  %vm723_vm0 = vmmov 0  }
  0x26   :  { %560 = vmatprep.subr.mxu0 %v80_v0  ;;  %v78_v2 = vld [vmem:[#allocation8 + $0x68] sm:$0xff]  ;;  %v77_v3 = vld [vmem:[#allocation8 + $0x60] sm:$0xff]  ;;  %v76_v5 = vld [vmem:[#allocation8 + $0x58] sm:$0xff]  ;;  %595 = vmatprep.subr.mxu1 %v722_v18  ;;  %vm313_vm1 = vcmask 64512  }
  0x27   :  { %561 = vmatpush3.msra.mxu0 %v80_v0  ;;  %v63_v4 = vld [vmem:[#allocation3] sm:$0xff]  ;;  %v75_v6 = vld [vmem:[#allocation8 + $0x50] sm:$0xff]  ;;  %v74_v7 = vld [vmem:[#allocation8 + $0x48] sm:$0xff]  ;;  %597 = vmatprep.mubr.msk.f32.mxu1 %vm723_vm0, %v722_v18 }
  0x28   :  { %562 = vmatprep.subr.mxu0 %v79_v1  ;;  %592 = vmatprep.mubr.f32.mxu0 %v63_v4  ;;  %v73_v8 = vld [vmem:[#allocation8 + $0x40] sm:$0xff]  ;;  %v72_v9 = vld [vmem:[#allocation8 + $0x38] sm:$0xff]  ;;  %v71_v10 = vld [vmem:[#allocation8 + $0x30] sm:$0xff] }
  0x29   :  { %563 = vmatpush3.msra.mxu0 %v79_v1  ;;  %v70_v11 = vld [vmem:[#allocation8 + $0x28] sm:$0xff]  ;;  %v69_v12 = vld [vmem:[#allocation8 + $0x20] sm:$0xff]  ;;  %v68_v13 = vld [vmem:[#allocation8 + $0x18] sm:$0xff] }
  0x2a   :  { %564 = vmatprep.subr.mxu0 %v78_v2  ;;  %v67_v14 = vld [vmem:[#allocation8 + $0x10] sm:$0xff]  ;;  %v66_v15 = vld [vmem:[#allocation8 + $0x8] sm:$0xff]  ;;  %v65_v16 = vld [vmem:[#allocation8] sm:$0xff] }
  0x2b   :  { %565 = vmatpush3.msra.mxu0 %v78_v2  ;;  %v768_v17 = vld [vmem:[#allocation3 + $0x8] sm:$0xff]  ;;  %v171_v19 = vld [vmem:[#allocation6] sm:$0xff]  ;;  %v531_v21 = vld [vmem:[%s802_s3] ss:$0 sm:$0xff]  ;;  %s724_s3 = smov [#allocation9]  }
  0x2c   :  { %566 = vmatprep.subr.mxu0 %v77_v3  ;;  %596 = vmatpush3.xpose.msra.mxu1 %v171_v19  ;;  %v172_v24 = vld [vmem:[#allocation6 + $0x8] sm:$0xff]  ;;  %s518_s5 = sshll.u32 %s724_s3, 4  ;;  %s519_s5 = int_to_ptr.vmem [resolvable:$true] %s518_s5 }
  0x2d   :  { %567 = vmatpush3.msra.mxu0 %v77_v3  ;;  %600 = vmatprep.subr.mxu1 %v722_v18  ;;  %s691_s6 = scalar_lea.vmem %s519_s5, 256  ;;  %p696_p2 = scmp.lt.s32.totalorder %s519_s5, %s519_s5 }
  0x2e   :  { %568 = vmatprep.subr.mxu0 %v76_v5  ;;  %p692_p1 = scmp.ne.s32.totalorder %s519_s5, %s691_s6  ;;  %p697_p3 = scmp.lt.s32.totalorder %s691_s6, %s691_s6 }
  0x2f   :  { %569 = vmatpush3.msra.mxu0 %v76_v5 }
  0x30   :  { %570 = vmatprep.subr.mxu0 %v75_v6  ;;  %p698_p4 = por %p697_p3, %p696_p2 }
  0x31   :  { %571 = vmatpush3.msra.mxu0 %v75_v6 }
  0x32   :  { %572 = vmatprep.subr.mxu0 %v74_v7  ;;  %p699_p5 = pnand %p698_p4, %p692_p1 }
  0x33   :  { %573 = vmatpush3.msra.mxu0 %v74_v7 }
  0x34   :  { %574 = vmatprep.subr.mxu0 %v73_v8 }
  0x35   :  { %575 = vmatpush3.msra.mxu0 %v73_v8 }
  0x36   :  { %576 = vmatprep.subr.mxu0 %v72_v9 }
  0x37   :  { %577 = vmatpush3.msra.mxu0 %v72_v9 }
  0x38   :  { %578 = vmatprep.subr.mxu0 %v71_v10 }
  0x39   :  { %579 = vmatpush3.msra.mxu0 %v71_v10 }
  0x3a   :  { %580 = vmatprep.subr.mxu0 %v70_v11 }
  0x3b   :  { %581 = vmatpush3.msra.mxu0 %v70_v11 }
  0x3c   :  { %582 = vmatprep.subr.mxu0 %v69_v12 }
  0x3d   :  { %583 = vmatpush3.msra.mxu0 %v69_v12 }
  0x3e   :  { %584 = vmatprep.subr.mxu0 %v68_v13 }
  0x3f   :  { %585 = vmatpush3.msra.mxu0 %v68_v13 }
  0x40   :  { %586 = vmatprep.subr.mxu0 %v67_v14 }
  0x41   :  { %587 = vmatpush3.msra.mxu0 %v67_v14 }
  0x42   :  { %588 = vmatprep.subr.mxu0 %v66_v15 }
  0x43   :  { %589 = vmatpush3.msra.mxu0 %v66_v15 }
  0x44   :  { %590 = vmatprep.subr.mxu0 %v65_v16 }
  0x45   :  { %591 = vmatpush3.msra.mxu0 %v65_v16 }
  0x46   :  { %593 = vmatmul.mubr.f32.vlgmr.msra.gmra.mxu0 %v768_v17 }
 0x106   :  { %v594_v20 = vpop.f32.mrf.mxu0 }
 0x107   :  { %v160_v25 = vadd.f32 %v594_v20, %v531_v21 }
 0x108   :  { %v154_v22 = vpop.f32.mrf.mxu0 }
 0x109   :  { %v155_v23 = vadd.f32 %v531_v21, %v154_v22 }
 0x10b   :  { %598 = vmatmul.mubr.f32.vlgmr.msra.gmra.mxu1 %v155_v23 }
 0x10c   :  { %601 = vmatpush3.xpose.msra.mxu1 %v172_v24  ;;  %602 = vmatprep.mubr.msk.f32.mxu1 %vm723_vm0, %v722_v18 }
 0x10d   :  { %605 = vmatprep.subr.mxu1 %v722_v18 }
 0x10f   :  { %603 = vmatmul.mubr.f32.vlgmr.msra.gmra.mxu1 %v160_v25 }
 0x110   :  { %606 = vmatpush3.msra.mxu1 %v63_v4  ;;  %607 = vmatprep.mubr.msk.f32.mxu1 %vm723_vm0, %v722_v18 }
 0x111   :  { %610 = vmatprep.subr.mxu1 %v722_v18 }
 0x1cb   :  { %v239_v26 = vpop.f32.mrf.mxu1 }
 0x1cc   :  { %v314_v27 = vsel %vm313_vm1, %v239_v26, -inf }
 0x1cd   :  { %v315_v28 = vrot.slane %v314_v27, 4  ;;  %v599_v29 = vpop.f32.mrf.mxu1 }
 0x1cf   :  { %v316_v30 = vmax.f32 %v314_v27, %v315_v28  ;;  %v309_v31 = vpop.f32.mrf.mxu1 }
 0x1d0   :  { %v321_v32 = vsel %vm313_vm1, %v309_v31, -inf }
 0x1d1   :  { %v317_v33 = vrot.slane %v316_v30, 2  ;;  %v322_v34 = vrot.slane %v321_v32, 4  ;;  %v604_v35 = vpop.f32.mrf.mxu1 }
 0x1d3   :  { %v318_v36 = vmax.f32 %v316_v30, %v317_v33  ;;  %v323_v37 = vmax.f32 %v321_v32, %v322_v34 }
 0x1d5   :  { %v319_v38 = vrot.slane %v318_v36, 1  ;;  %v324_v39 = vrot.slane %v323_v37, 2 }
 0x1d7   :  { %v320_v40 = vmax.f32 %v318_v36, %v319_v38  ;;  %v325_v41 = vmax.f32 %v323_v37, %v324_v39 }
 0x1d9   :  { %v328_v42 = vsub.f32 %v239_v26, %v320_v40  ;;  %v326_v43 = vrot.slane %v325_v41, 1 }
 0x1db   :  { %v330_v44 = vmul.f32 1.442695, %v328_v42  ;;  %v327_v45 = vmax.f32 %v325_v41, %v326_v43 }
 0x1dd   :  { %623 = vpow2.f32 %v330_v44  ;;  %v329_v46 = vsub.f32 %v309_v31, %v327_v45 }
 0x1df   :  { %v332_v47 = vmul.f32 1.442695, %v329_v46 }
 0x1e1   :  { %625 = vpow2.f32 %v332_v47 }
 0x1ea   :  { %v624_v48 = vpop.eup %623 }
 0x1eb   :  { %v334_v49 = vsel %vm313_vm1, %v624_v48, 0.0 }
 0x1ec   :  { %v335_v50 = vrot.slane %v334_v49, 4 }
 0x1ee   :  { %v626_v51 = vpop.eup %625  ;;  %v336_v52 = vadd.f32 %v335_v50, %v334_v49 }
 0x1ef   :  { %v341_v53 = vsel %vm313_vm1, %v626_v51, 0.0 }
 0x1f0   :  { %v337_v54 = vrot.slane %v336_v52, 2  ;;  %v342_v55 = vrot.slane %v341_v53, 4 }
 0x1f2   :  { %v338_v56 = vadd.f32 %v337_v54, %v336_v52  ;;  %v343_v57 = vadd.f32 %v342_v55, %v341_v53 }
 0x1f4   :  { %v339_v58 = vrot.slane %v338_v56, 1  ;;  %v344_v59 = vrot.slane %v343_v57, 2 }
 0x1f6   :  { %v340_v60 = vadd.f32 %v339_v58, %v338_v56  ;;  %v345_v61 = vadd.f32 %v344_v59, %v343_v57 }
 0x1f8   :  { %627 = vrcp.f32 %v340_v60  ;;  %v346_v62 = vrot.slane %v345_v61, 1 }
 0x1fa   :  { %v347_v63 = vadd.f32 %v346_v62, %v345_v61 }
 0x1fc   :  { %629 = vrcp.f32 %v347_v63 }
 0x205   :  { %v628_v0 = vpop.eup %627 }
 0x206   :  { %v350_v1 = vmul.f32 %v628_v0, %v624_v48 }
 0x208   :  { %608 = vmatmul.mubr.msk.f32.vlgmr.msra.gmra.mxu1 %vm313_vm1, %v350_v1 }
 0x209   :  { %v630_v2 = vpop.eup %629  ;;  %611 = vmatpush3.msra.mxu1 %v768_v17  ;;  %612 = vmatprep.mubr.msk.f32.mxu1 %vm723_vm0, %v722_v18 }
 0x20a   :  { %v351_v3 = vmul.f32 %v630_v2, %v626_v51 }
 0x20c   :  { %613 = vmatmul.mubr.msk.f32.vlgmr.msra.gmra.mxu1 %vm313_vm1, %v351_v3 }
 0x2c8   :  { %v421_v4 = vpop.f32.mrf.mxu1 }
 0x2c9   :  { %501 = vst [vmem:[#allocation9] sm:$0xff] %v421_v4 }
 0x2ca   :  { %v609_v5 = vpop.f32.mrf.mxu1 }
 0x2cc   :  { %v494_v6 = vpop.f32.mrf.mxu1 }
 0x2cd   :  { %502 = vst [vmem:[#allocation9 + $0x8] sm:$0xff] %v494_v6 }
 0x2ce   :  { %v614_v7 = vpop.f32.mrf.mxu1 }
 0x2cf   :  { %702 = shalt.err (!%p699_p5)
}
 0x2d0   :  { %524 = dma.vmem_to_hbm [thread:$0]  %s519_s5, 256, %s803_s4, [#allocation5], %s719_s20, %s719_s20, %s720_s21  }
 0x2d1   :  { %715 = dma.done.wait [#allocation5], 256  }
 0x2d2   :  { %716 = vsyncadd [#allocation5], 4294967040 }
 0x2d3   :  { %528 = vsyncpa [#allocation4], 1 }
 0x2d4   :  { %529 = vsyncpa [#allocation7], 1 }
 0x2d5   :  { %530 = vsyncpa [#allocation5], 1 }

</bundles_post_ra>
